<compile_context>
chip_gen: v5e
topology: v5e:2x2
jax: 0.10.0
libtpu: 0.0.40
codegen_flags: <defaults>
</compile_context>

<pallas_src>
import functools

import jax
import jax.numpy as jnp
from jax import lax
from jax.experimental import pallas as pl
from jax.experimental.pallas import tpu as pltpu


def _round_up(a, b):
    return (a + b - 1) // b * b


def _tpu_vmem_and_cores():
    """Best-effort query of per-core VMEM capacity and TensorCores per chip."""
    vmem_bytes = 64 * 1024 * 1024   # conservative default (v7x-sized)
    num_cores = 1
    try:
        info = pltpu.get_tpu_info()
        vmem_bytes = int(getattr(info, "vmem_capacity_bytes", vmem_bytes))
        num_cores = int(getattr(info, "num_tensorcores",
                                getattr(info, "num_cores", num_cores)) or 1)
    except Exception:
        pass
    try:
        dev = jax.devices()[0]
        num_cores = max(num_cores, int(getattr(dev, "num_cores", 1) or 1))
    except Exception:
        pass
    return vmem_bytes, max(1, num_cores)


def _cond_ln_kernel(x_ref, w_ref, b_ref, o_ref, *, eps, inv_n, pad_cols):
    # x: (t_tile, N_pad).  Normalize each row over the true N = B*C columns
    # (zero-padded columns are corrected for exactly below).
    x = x_ref[...].astype(jnp.float32)
    w = w_ref[...].astype(jnp.float32)          # (1, N_pad), zeros in padding
    b = b_ref[...].astype(jnp.float32)          # (1, N_pad), zeros in padding

    mean = jnp.sum(x, axis=-1, keepdims=True) * inv_n        # (t, 1)
    xm = x - mean
    s2 = jnp.sum(xm * xm, axis=-1, keepdims=True)            # (t, 1)
    if pad_cols:
        # zero-padded columns contribute pad_cols * mean^2 to s2; remove it.
        s2 = s2 - float(pad_cols) * (mean * mean)
    var = s2 * inv_n
    inv = lax.rsqrt(var + eps)

    # Padded columns: w = b = 0 -> output 0 there (sliced off in the wrapper).
    o_ref[...] = (xm * (inv * w) + b).astype(o_ref.dtype)


def cond_layer_norm(x, spk_emb, w_ln, b_ln, *, eps=1e-5, t_tile=None):
    """x: (T, B, C); spk_emb: (B, S); w_ln, b_ln: (C, S) (Linear weights)."""
    T, B, C = x.shape
    S = spk_emb.shape[-1]
    assert w_ln.shape == (C, S) and b_ln.shape == (C, S)
    N = B * C
    N_pad = _round_up(N, 128)
    pad_cols = N_pad - N

    # --- Grid-invariant affine params: computed ONCE in the wrapper (XLA). ---
    weight = (spk_emb.astype(jnp.float32) @ w_ln.astype(jnp.float32).T)  # (B, C)
    bias = (spk_emb.astype(jnp.float32) @ b_ln.astype(jnp.float32).T)    # (B, C)
    weight = weight.reshape(1, N)
    bias = bias.reshape(1, N)

    # --- Lane-dense layout: (T, B, C) -> (T, N) (free row-major reshape). ---
    x2 = x.reshape(T, N)
    if pad_cols:
        # Only when N isn't 128-aligned: avoids masked vst on the whole path.
        x2 = jnp.pad(x2, ((0, 0), (0, pad_cols)))
        weight = jnp.pad(weight, ((0, 0), (0, pad_cols)))
        bias = jnp.pad(bias, ((0, 0), (0, pad_cols)))

    # --- Generation-aware VMEM budget / limit. ---
    vmem_cap, num_cores = _tpu_vmem_and_cores()
    # e.g. v7x (64 MiB): limit 48 MiB;  v5e/v6e (128 MiB): limit 96 MiB.
    vmem_limit = max(32 << 20, min(vmem_cap - (16 << 20), (vmem_cap * 3) // 4))
    budget = max(16 << 20, vmem_limit - (8 << 20))

    # --- Pick t_tile: biggest that fits; cap for megacore only. ---
    itemsize = x.dtype.itemsize
    t_full = _round_up(T, 8)
    if t_tile is None:
        # 2x double-buffered input + 2x double-buffered output + ~3 f32 temps.
        bytes_per_row = N_pad * (2 * itemsize + 2 * itemsize + 3 * 4)
        t_fit = max(8, (budget // max(bytes_per_row, 1)) // 8 * 8)
        if num_cores > 1:
            # Multi-TC chip (v7x): give every core work, but never shrink a
            # tile below the ~512-row HBM-roofline knee.
            t_cap = max(512, _round_up(pl.cdiv(T, 2 * num_cores), 8))
            t_tile = min(t_fit, t_cap, t_full)
        else:
            # Single TC (v5e/v6e): the grid is a serial loop; just go big.
            t_tile = min(t_fit, t_full)
    t_tile = max(8, min(int(t_tile), t_full))

    # Even out tiles across steps to shrink the ragged tail (never grows tile).
    steps = pl.cdiv(T, t_tile)
    t_tile = max(8, _round_up(pl.cdiv(T, steps), 8))

    # No T padding: Pallas masks the ragged last block; rows are independent,
    # so the undefined tail rows only feed output rows that are never written.
    grid = (pl.cdiv(T, t_tile),)

    out = pl.pallas_call(
        functools.partial(_cond_ln_kernel, eps=float(eps), inv_n=1.0 / N,
                          pad_cols=pad_cols),
        out_shape=jax.ShapeDtypeStruct((T, N_pad), x.dtype),
        grid_spec=pltpu.PrefetchScalarGridSpec(
            num_scalar_prefetch=0,
            grid=grid,
            in_specs=[
                pl.BlockSpec((t_tile, N_pad), lambda t: (t, 0)),
                pl.BlockSpec((1, N_pad), lambda t: (0, 0)),  # weight (const)
                pl.BlockSpec((1, N_pad), lambda t: (0, 0)),  # bias   (const)
            ],
            out_specs=pl.BlockSpec((t_tile, N_pad), lambda t: (t, 0)),
        ),
        compiler_params=pltpu.CompilerParams(
            dimension_semantics=("parallel",),
            vmem_limit_bytes=int(vmem_limit),
        ),
    )(x2, weight, bias)

    if pad_cols:
        out = out[:, :N]
    return out.reshape(T, B, C)


def cond_layer_norm_ref(x, spk_emb, w_ln, b_ln, eps=1e-5):
    weight = spk_emb @ w_ln.T          # (B, C)
    bias = spk_emb @ b_ln.T            # (B, C)
    mean = jnp.mean(x, axis=(1, 2), keepdims=True)
    var = jnp.mean((x - mean) ** 2, axis=(1, 2), keepdims=True)
    return (x - mean) / jnp.sqrt(var + eps) * weight[None] + bias[None]


if __name__ == "__main__":
    key = jax.random.PRNGKey(0)
    T, B = 16, 2
    dim_last, dim_spk = 32, 64
    eps = 1e-5

    k1, k2, k3, k4 = jax.random.split(key, 4)
    x = jax.random.normal(k1, (T, B, dim_last), dtype=jnp.float32)
    spk_emb = jax.random.normal(k2, (B, dim_spk), dtype=jnp.float32)

    # Parameters of weight_ln / bias_ln (Linear(dim_spk, dim_last, bias=False)).
    # reset_parameters() sets ones / zeros; perturb so the affine path is
    # actually exercised.
    w_ln = jnp.ones((dim_last, dim_spk), jnp.float32) \
        + 0.01 * jax.random.normal(k3, (dim_last, dim_spk), dtype=jnp.float32)
    b_ln = jnp.zeros((dim_last, dim_spk), jnp.float32) \
        + 0.01 * jax.random.normal(k4, (dim_last, dim_spk), dtype=jnp.float32)

    out = cond_layer_norm(x, spk_emb, w_ln, b_ln, eps=eps)
    out = jax.block_until_ready(out)

    ref = cond_layer_norm_ref(x, spk_emb, w_ln, b_ln, eps=eps)
    assert out.shape == ref.shape
    assert jnp.max(jnp.abs(out - ref)) < 1e-4, "mismatch vs reference"

    print("KERNEL_OK")
</pallas_src>

<mosaic_0001>
module attributes {stable_mosaic.version = 11 : i64} {
  func.func @_cond_ln_kernel(%arg0: i32, %arg1: memref<16x128xf32, #tpu.memory_space<vmem>>, %arg2: memref<1x128xf32, #tpu.memory_space<vmem>>, %arg3: memref<1x128xf32, #tpu.memory_space<vmem>>, %arg4: memref<16x128xf32, #tpu.memory_space<vmem>>) attributes {dimension_semantics = [#tpu.dimension_semantics<parallel>], iteration_bounds = array<i64: 1>, scalar_prefetch = 0 : i64, scratch_operands = 0 : i64, tpu.core_type = #tpu.core_type<tc>, window_params = [{transform_indices = @transform_0, window_bounds = array<i64: 16, 128>}, {pipeline_mode = #tpu.pipeline_mode<synchronous>, transform_indices = @transform_1, window_bounds = array<i64: 1, 128>}, {pipeline_mode = #tpu.pipeline_mode<synchronous>, transform_indices = @transform_2, window_bounds = array<i64: 1, 128>}, {transform_indices = @transform_3, window_bounds = array<i64: 16, 128>}]} {
    %c0 = arith.constant 0 : index
    %c0_0 = arith.constant 0 : index
    %0 = vector.load %arg1[%c0, %c0_0] : memref<16x128xf32, #tpu.memory_space<vmem>>, vector<16x128xf32>
    %c0_1 = arith.constant 0 : index
    %c0_2 = arith.constant 0 : index
    %1 = vector.load %arg2[%c0_1, %c0_2] : memref<1x128xf32, #tpu.memory_space<vmem>>, vector<1x128xf32>
    %c0_3 = arith.constant 0 : index
    %c0_4 = arith.constant 0 : index
    %2 = vector.load %arg3[%c0_3, %c0_4] : memref<1x128xf32, #tpu.memory_space<vmem>>, vector<1x128xf32>
    %cst = arith.constant dense<0.000000e+00> : vector<16xf32>
    %3 = vector.multi_reduction <add>, %0, %cst [1] : vector<16x128xf32> to vector<16xf32>
    %4 = vector.shape_cast %3 : vector<16xf32> to vector<16x1xf32>
    %cst_5 = arith.constant 1.562500e-02 : f32
    %5 = vector.broadcast %cst_5 : f32 to vector<16x1xf32>
    %6 = arith.mulf %4, %5 : vector<16x1xf32>
    %7 = vector.broadcast %6 : vector<16x1xf32> to vector<16x128xf32>
    %8 = arith.subf %0, %7 : vector<16x128xf32>
    %9 = arith.mulf %8, %8 : vector<16x128xf32>
    %cst_6 = arith.constant dense<0.000000e+00> : vector<16xf32>
    %10 = vector.multi_reduction <add>, %9, %cst_6 [1] : vector<16x128xf32> to vector<16xf32>
    %11 = vector.shape_cast %10 : vector<16xf32> to vector<16x1xf32>
    %12 = arith.mulf %6, %6 : vector<16x1xf32>
    %cst_7 = arith.constant 6.400000e+01 : f32
    %13 = vector.broadcast %cst_7 : f32 to vector<16x1xf32>
    %14 = arith.mulf %13, %12 : vector<16x1xf32>
    %15 = arith.subf %11, %14 : vector<16x1xf32>
    %cst_8 = arith.constant 1.562500e-02 : f32
    %16 = vector.broadcast %cst_8 : f32 to vector<16x1xf32>
    %17 = arith.mulf %15, %16 : vector<16x1xf32>
    %cst_9 = arith.constant 9.99999974E-6 : f32
    %18 = vector.broadcast %cst_9 : f32 to vector<16x1xf32>
    %19 = arith.addf %17, %18 : vector<16x1xf32>
    %20 = math.rsqrt %19 : vector<16x1xf32>
    %21 = vector.broadcast %20 : vector<16x1xf32> to vector<16x128xf32>
    %22 = vector.broadcast %1 : vector<1x128xf32> to vector<16x128xf32>
    %23 = arith.mulf %21, %22 : vector<16x128xf32>
    %24 = arith.mulf %8, %23 : vector<16x128xf32>
    %25 = vector.broadcast %2 : vector<1x128xf32> to vector<16x128xf32>
    %26 = arith.addf %24, %25 : vector<16x128xf32>
    %c0_10 = arith.constant 0 : index
    %c0_11 = arith.constant 0 : index
    %27 = vector.load %arg4[%c0_10, %c0_11] : memref<16x128xf32, #tpu.memory_space<vmem>>, vector<16x128xf32>
    tpu.vector_store %arg4[%c0_10, %c0_11], %26 {strides = array<i32>} : memref<16x128xf32, #tpu.memory_space<vmem>>, vector<16x128xf32>,
    return
  }
  func.func @transform_0(%arg0: i32) -> (i32, i32) {
    %c0_i32 = arith.constant 0 : i32
    %c0_i32_0 = arith.constant 0 : i32
    return %arg0, %c0_i32 : i32, i32
  }
  func.func @transform_1(%arg0: i32) -> (i32, i32) {
    %c0_i32 = arith.constant 0 : i32
    %c0_i32_0 = arith.constant 0 : i32
    %c0_i32_1 = arith.constant 0 : i32
    return %c0_i32, %c0_i32_0 : i32, i32
  }
  func.func @transform_2(%arg0: i32) -> (i32, i32) {
    %c0_i32 = arith.constant 0 : i32
    %c0_i32_0 = arith.constant 0 : i32
    %c0_i32_1 = arith.constant 0 : i32
    return %c0_i32, %c0_i32_0 : i32, i32
  }
  func.func @transform_3(%arg0: i32) -> (i32, i32) {
    %c0_i32 = arith.constant 0 : i32
    %c0_i32_0 = arith.constant 0 : i32
    return %arg0, %c0_i32 : i32, i32
  }
}

</mosaic_0001>

<bundles_post_ra>
// kernel: tpu_custom_call.1
= control target key start
LH: loop header
LB: loop body
LE: loop exit
PB: predicated region body
PF: predicated region fallthrough
CT: control target
= control target key end

     0   :  { %8 = vsyncpa [#allocation3], 0  ;;  %s259_s0 = inlined_call_operand.hbm [shape: f32[16,128], index: 0, kind: input, shape index: {}]   ;;  %s260_s1 = inlined_call_operand.hbm [shape: f32[1,128], index: 1, kind: input, shape index: {}]   ;;  %s261_s2 = inlined_call_operand.vmem [shape: f32[1,128], index: 2, kind: input, shape index: {}]   ;;  %s262_s3 = inlined_call_operand.hbm [shape: f32[16,128], index: 3, kind: output, shape index: {}]  }
   0x1   :  { %9 = vsyncpa [#allocation6], 0 }
   0x2   :  { %10 = vsyncpa [#allocation4], 0  ;;  %s15_s14 = sshll.u32 %s259_s0, 4  ;;  %s216_s15 = smov [#allocation2]   ;;  %s16_s14 = int_to_ptr.hbm [resolvable:$true] %s15_s14 }
   0x3   :  { %s17_s16 = sshll.u32 %s216_s15, 4  ;;  %s29_s19 = sshll.u32 %s260_s1, 4  ;;  %s18_s16 = int_to_ptr.vmem [resolvable:$true] %s17_s16  ;;  %s30_s19 = int_to_ptr.hbm [resolvable:$true] %s29_s19 }
   0x4   :  { %s217_s20 = smov 128   ;;  %s218_s21 = smov 8  }
   0x5   :  { %23 = dma.hbm_to_vmem [thread:$0]  %s16_s14, 256, %s18_s16, [#allocation3], %s217_s20, %s217_s20, %s218_s21  }
   0x6   :  { %s219_s22 = smov [#allocation5]  }
   0x7   :  { %s31_s23 = sshll.u32 %s219_s22, 4  ;;  %s32_s23 = int_to_ptr.vmem [resolvable:$true] %s31_s23 }
   0x8   :  { %34 = dma.hbm_to_vmem [thread:$0]  %s30_s19, 16, %s32_s23, [#allocation6]  }
   0x9   :  { %210 = dma.done.wait [#allocation3], 256  }
   0xa   :  { %211 = vsyncadd [#allocation3], 4294967040 }
   0xb   :  { %212 = dma.done.wait [#allocation6], 16  }
   0xc   :  { %213 = vsyncadd [#allocation6], 4294967280  ;;  %v45_v0 = vld [vmem:[#allocation2] sm:$0xff]  ;;  %v46_v1 = vld [vmem:[#allocation2 + $0x8] sm:$0xff]  ;;  %s220_s24 = smov [#allocation7]   ;;  %s113_s28 = sshll.u32 %s262_s3, 4  ;;  %s114_s28 = int_to_ptr.hbm [resolvable:$true] %s113_s28 }
   0xd   :  { %49 = vadd.xlane.f32.xlu0 %v45_v0  ;;  %v132_v28 = vld [vmem:[#allocation5] ss:$0 sm:$0xff]  ;;  %v133_v34 = vld [vmem:[%s261_s2] ss:$0 sm:$0xff]  ;;  %s111_s25 = sshll.u32 %s220_s24, 4  ;;  %s112_s25 = int_to_ptr.vmem [resolvable:$true] %s111_s25 }
  0x15   :  { %51 = vadd.xlane.f32.xlu0 %v46_v1 }
  0x80   :  { %v50_v2 = vpop.xlane.xlu0 %49 }
  0x81   :  { %v53_v3 = vmul.f32 0.015625, %v50_v2 }
  0x83   :  { %v55_v4 = vsub.f32 %v45_v0, %v53_v3  ;;  %v63_v10 = vmul.f32 %v53_v3, %v53_v3 }
  0x85   :  { %v57_v5 = vmul.f32 %v55_v4, %v55_v4  ;;  %v65_v11 = vmul.f32 64.0, %v63_v10 }
  0x87   :  { %59 = vadd.xlane.f32.xlu1 %v57_v5 }
  0x88   :  { %v52_v6 = vpop.xlane.xlu0 %51 }
  0x89   :  { %v54_v7 = vmul.f32 0.015625, %v52_v6 }
  0x8b   :  { %v56_v8 = vsub.f32 %v46_v1, %v54_v7  ;;  %v64_v14 = vmul.f32 %v54_v7, %v54_v7 }
  0x8d   :  { %v58_v9 = vmul.f32 %v56_v8, %v56_v8  ;;  %v66_v17 = vmul.f32 64.0, %v64_v14 }
  0x8f   :  { %61 = vadd.xlane.f32.xlu1 %v58_v9 }
  0xfa   :  { %v60_v12 = vpop.xlane.xlu1 %59 }
  0xfb   :  { %v67_v13 = vsub.f32 %v60_v12, %v65_v11 }
  0xfd   :  { %v69_v15 = vmul.f32 0.015625, %v67_v13 }
  0xff   :  { %v71_v16 = vadd.f32 1e-05, %v69_v15 }
 0x101   :  { %134 = vrsqrt.f32 %v71_v16  ;;  %vm79_vm1 = vweird.f32 %v71_v16 }
 0x102   :  { %v62_v18 = vpop.xlane.xlu1 %61 }
 0x103   :  { %v68_v19 = vsub.f32 %v62_v18, %v66_v17 }
 0x105   :  { %v70_v20 = vmul.f32 0.015625, %v68_v19 }
 0x107   :  { %v135_v21 = vpop.eup %134  ;;  %v72_v22 = vadd.f32 1e-05, %v70_v20 }
 0x108   :  { %v74_v23 = vmul.f32 %v135_v21, %v71_v16  ;;  %vm80_vm0 = vweird.f32 %v135_v21 }
 0x109   :  { %136 = vrsqrt.f32 %v72_v22  ;;  %vm81_vm2 = vmor %vm79_vm1, %vm80_vm0  ;;  %vm89_vm4 = vweird.f32 %v72_v22 }
 0x10a   :  { %v75_v24 = vmul.f32 %v135_v21, %v74_v23 }
 0x10c   :  { %v76_v25 = vmul.f32 0.5, %v75_v24 }
 0x10e   :  { %v77_v26 = vsub.f32 1.5, %v76_v25 }
 0x10f   :  { %v137_v27 = vpop.eup %136 }
 0x110   :  { %v78_v29 = vmul.f32 %v135_v21, %v77_v26  ;;  %v84_v30 = vmul.f32 %v137_v27, %v72_v22  ;;  %vm90_vm3 = vweird.f32 %v137_v27 }
 0x111   :  { %vm91_vm5 = vmor %vm89_vm4, %vm90_vm3 }
 0x112   :  { %v82_v31 = vsel %vm81_vm2, %v135_v21, %v78_v29  ;;  %v85_v32 = vmul.f32 %v137_v27, %v84_v30 }
 0x113   :  { %v96_v33 = vmul.f32 %v132_v28, %v82_v31 }
 0x114   :  { %v86_v35 = vmul.f32 0.5, %v85_v32 }
 0x115   :  { %v98_v36 = vmul.f32 %v96_v33, %v55_v4 }
 0x116   :  { %v87_v37 = vsub.f32 1.5, %v86_v35 }
 0x117   :  { %v103_v38 = vadd.f32 %v133_v34, %v98_v36 }
 0x118   :  { %v88_v39 = vmul.f32 %v137_v27, %v87_v37 }
 0x119   :  { %105 = vst [vmem:[#allocation7] sm:$0xff] %v103_v38 }
 0x11a   :  { %v92_v40 = vsel %vm91_vm5, %v137_v27, %v88_v39 }
 0x11b   :  { %v97_v41 = vmul.f32 %v132_v28, %v92_v40 }
 0x11d   :  { %v99_v42 = vmul.f32 %v97_v41, %v56_v8 }
 0x11f   :  { %v104_v43 = vadd.f32 %v133_v34, %v99_v42 }
 0x121   :  { %106 = vst [vmem:[#allocation7 + $0x8] sm:$0xff] %v104_v43 }
 0x122   :  { %119 = dma.vmem_to_hbm [thread:$0]  %s112_s25, 256, %s114_s28, [#allocation4], %s217_s20, %s217_s20, %s218_s21  }
 0x123   :  { %214 = dma.done.wait [#allocation4], 256  }
 0x124   :  { %215 = vsyncadd [#allocation4], 4294967040 }
 0x125   :  { %124 = vsyncpa [#allocation3], 1 }
 0x126   :  { %125 = vsyncpa [#allocation6], 1 }
 0x127   :  { %126 = vsyncpa [#allocation4], 1 }

</bundles_post_ra>
